<compile_context>
chip_gen: v7x
topology: tpu7x:2x2x1
jax: 0.10.0
libtpu: 0.0.40
codegen_flags: <defaults>
</compile_context>

<pallas_src>
import numpy as np
import jax
import jax.numpy as jnp
from jax.experimental import pallas as pl
from jax.experimental.pallas import tpu as pltpu


# ---------------------------------------------------------------------------
# Deterministic reproduction of FNOClassifier.__init__'s `base` buffer.
# The PyTorch module uses numpy's global RNG (np.random.permutation), so a
# seeded numpy RandomState reproduces the construction exactly.
# ---------------------------------------------------------------------------
def _build_base(num_features, num_classes, seed=0):
    rng = np.random.RandomState(seed)
    rnd_indices = rng.permutation(np.arange(num_features))
    n = num_features // num_classes
    feat_indices = [rnd_indices[i * n:(i + 1) * n] for i in range(num_classes)]
    rem = num_features % num_classes
    rem_indices = rng.permutation(np.arange(num_classes))[:rem]
    for i, rem_idx in enumerate(rem_indices):
        feat_indices[rem_idx] = np.append(
            feat_indices[rem_idx], rnd_indices[num_classes * n + i])
    base = np.zeros((num_classes, num_features), dtype=np.float32)
    for i in range(num_classes):
        base[i][feat_indices[i]] = 1.0
    # F.normalize(base, dim=1): L2-normalize each row (eps=1e-12)
    norms = np.maximum(np.linalg.norm(base, axis=1, keepdims=True), 1e-12)
    base = base / norms
    return jnp.asarray(base), feat_indices


def _round_up(x, m):
    return (x + m - 1) // m * m


# VMEM budgeting: stay well inside v7x's 64 MiB physical per TensorCore.
# Double-buffered x / out tiles plus the (double-buffered) lane-padded weight.
_VMEM_LIMIT_BYTES = 32 << 20    # requested scoped VMEM (v7x default)
_VMEM_BUDGET_BYTES = 24 << 20   # what we size tiles against (headroom)


def _pick_batch_tile(B, F, Cp, in_itemsize, out_itemsize):
    tb = min(512, _round_up(B, 8))                    # big tiles amortize ~0.35us/step
    w_bytes = 2 * F * Cp * in_itemsize                # weight (double-buffered)

    def footprint(t):
        return w_bytes + 2 * t * F * in_itemsize + 2 * t * Cp * out_itemsize

    while tb > 8 and footprint(tb) > _VMEM_BUDGET_BYTES:
        tb = max(8, _round_up(tb // 2, 8))
    return tb


# ---------------------------------------------------------------------------
# Kernel: one lane-dense MXU matmul per batch tile.
#   x_ref : (tb, F)     batch tile of inputs
#   w_ref : (F, Cp)     base.T, zero-padded to Cp lanes (constant block)
#   o_ref : (tb, Cp)    lane-dense f32 output tile
# ---------------------------------------------------------------------------
def _linear_kernel(x_ref, w_ref, o_ref):
    o_ref[...] = jnp.dot(
        x_ref[...], w_ref[...], preferred_element_type=jnp.float32
    ).astype(o_ref.dtype)


def fno_classifier_forward(x, base, *, compute_dtype=None, lane_pad=128):
    """out = x @ base.T  (== F.linear(x, base, None)), any batch size."""
    B, F = x.shape
    C = base.shape[0]
    orig_dtype = x.dtype

    # Optional narrow-input path (recommended on v5e/v6e: kernel is HBM-bound).
    if compute_dtype is not None:
        x = x.astype(compute_dtype)
        base = base.astype(compute_dtype)

    in_itemsize = jnp.dtype(x.dtype).itemsize
    out_itemsize = 4  # f32 accumulator / output

    # Lane-pad the class dimension to a multiple of 128 (zero columns) so the
    # output store is an unmasked, lane-dense vst and the MXU N dim is full.
    Cp = _round_up(max(C, 1), lane_pad)
    w = jnp.zeros((F, Cp), dtype=x.dtype).at[:, :C].set(base.T.astype(x.dtype))

    # Batch tile + ragged-batch padding (grid = Bp // tb).
    tb = _pick_batch_tile(B, F, Cp, in_itemsize, out_itemsize)
    Bp = _round_up(B, tb)
    if Bp != B:
        x = jnp.pad(x, ((0, Bp - B), (0, 0)))
    grid = (Bp // tb,)

    cost = pl.CostEstimate(
        flops=2 * Bp * F * Cp,
        transcendentals=0,
        bytes_accessed=Bp * F * in_itemsize + F * Cp * in_itemsize
        + Bp * Cp * out_itemsize,
    )

    out = pl.pallas_call(
        _linear_kernel,
        out_shape=jax.ShapeDtypeStruct((Bp, Cp), jnp.float32),
        grid_spec=pltpu.PrefetchScalarGridSpec(
            num_scalar_prefetch=0,
            grid=grid,
            in_specs=[
                pl.BlockSpec((tb, F), lambda i: (i, 0)),   # batch tile of x
                pl.BlockSpec((F, Cp), lambda i: (0, 0)),   # full weight (copy skipped
                                                           # on repeated block index)
            ],
            out_specs=pl.BlockSpec((tb, Cp), lambda i: (i, 0)),
        ),
        compiler_params=pltpu.CompilerParams(
            dimension_semantics=("parallel",),             # shards batch across TCs on v7x
            vmem_limit_bytes=_VMEM_LIMIT_BYTES,
        ),
        cost_estimate=cost,
    )(x, w)

    return out[:B, :C].astype(orig_dtype)


if __name__ == "__main__":
    key = jax.random.PRNGKey(0)

    # --- Case 1: small, aligned shapes (module-default-ish) -----------------
    num_features, num_classes, batch = 128, 8, 16
    base, _ = _build_base(num_features, num_classes, seed=0)
    k1, k2 = jax.random.split(key)
    x = jax.random.normal(k1, (batch, num_features), dtype=jnp.float32)

    out = jax.block_until_ready(fno_classifier_forward(x, base))
    ref = x @ base.T
    assert out.shape == (batch, num_classes)
    assert jnp.allclose(out, ref, atol=1e-4, rtol=1e-4)

    # --- Case 2: ragged batch / non-128 feature count (padding paths) -------
    nf2, nc2, b2 = 96, 10, 10
    base2, _ = _build_base(nf2, nc2, seed=0)
    x2 = jax.random.normal(k2, (b2, nf2), dtype=jnp.float32)

    out2 = jax.block_until_ready(fno_classifier_forward(x2, base2))
    ref2 = x2 @ base2.T
    assert out2.shape == (b2, nc2)
    assert jnp.allclose(out2, ref2, atol=1e-4, rtol=1e-4)

    print("KERNEL_OK")
</pallas_src>

<mosaic_0001>
module attributes {stable_mosaic.version = 11 : i64} {
  func.func @_linear_kernel(%arg0: i32, %arg1: memref<16x128xf32, #tpu.memory_space<vmem>>, %arg2: memref<128x128xf32, #tpu.memory_space<vmem>>, %arg3: memref<16x128xf32, #tpu.memory_space<vmem>>) attributes {dimension_semantics = [#tpu.dimension_semantics<parallel>], iteration_bounds = array<i64: 1>, scalar_prefetch = 0 : i64, scratch_operands = 0 : i64, tpu.core_type = #tpu.core_type<tc>, window_params = [{transform_indices = @transform_0, window_bounds = array<i64: 16, 128>}, {pipeline_mode = #tpu.pipeline_mode<synchronous>, transform_indices = @transform_1, window_bounds = array<i64: 128, 128>}, {transform_indices = @transform_2, window_bounds = array<i64: 16, 128>}]} {
    %c0 = arith.constant 0 : index
    %c0_0 = arith.constant 0 : index
    %0 = vector.load %arg1[%c0, %c0_0] : memref<16x128xf32, #tpu.memory_space<vmem>>, vector<16x128xf32>
    %c0_1 = arith.constant 0 : index
    %c0_2 = arith.constant 0 : index
    %1 = vector.load %arg2[%c0_1, %c0_2] : memref<128x128xf32, #tpu.memory_space<vmem>>, vector<128x128xf32>
    %cst = arith.constant dense<0.000000e+00> : vector<16x128xf32>
    %2 = tpu.matmul %0, %1, %cst {dimension_numbers = #tpu.dot_dimension_numbers<[1], [0], [0], [1], [0, 0, 1, 1], [], []>} : vector<16x128xf32>, vector<128x128xf32>, vector<16x128xf32> -> vector<16x128xf32>
    %c0_3 = arith.constant 0 : index
    %c0_4 = arith.constant 0 : index
    %3 = vector.load %arg3[%c0_3, %c0_4] : memref<16x128xf32, #tpu.memory_space<vmem>>, vector<16x128xf32>
    tpu.vector_store %arg3[%c0_3, %c0_4], %2 {strides = array<i32>} : memref<16x128xf32, #tpu.memory_space<vmem>>, vector<16x128xf32>,
    return
  }
  func.func @transform_0(%arg0: i32) -> (i32, i32) {
    %c0_i32 = arith.constant 0 : i32
    %c0_i32_0 = arith.constant 0 : i32
    return %arg0, %c0_i32 : i32, i32
  }
  func.func @transform_1(%arg0: i32) -> (i32, i32) {
    %c0_i32 = arith.constant 0 : i32
    %c0_i32_0 = arith.constant 0 : i32
    %c0_i32_1 = arith.constant 0 : i32
    return %c0_i32, %c0_i32_0 : i32, i32
  }
  func.func @transform_2(%arg0: i32) -> (i32, i32) {
    %c0_i32 = arith.constant 0 : i32
    %c0_i32_0 = arith.constant 0 : i32
    return %arg0, %c0_i32 : i32, i32
  }
}

</mosaic_0001>

<bundles_post_ra>
// kernel: tpu_custom_call.1
= control target key start
LH: loop header
LB: loop body
LE: loop exit
PB: predicated region body
PF: predicated region fallthrough
CT: control target
= control target key end

     0   :  { %7 = vsyncpa [#allocation3], 0  ;;  %s380_s0 = inlined_call_operand.hbm [shape: f32[16,128], index: 0, kind: input, shape index: {}]   ;;  %s381_s1 = inlined_call_operand.hbm [shape: f32[128,128], index: 1, kind: input, shape index: {}]   ;;  %s382_s2 = inlined_call_operand.hbm [shape: f32[16,128], index: 2, kind: output, shape index: {}]  }
   0x1   :  { %8 = vsyncpa [#allocation6], 0 }
   0x2   :  { %9 = vsyncpa [#allocation4], 0  ;;  %s315_s9 = smov [#allocation2]   ;;  %s243_s13 = scalar_lea.hbm %s380_s0, 256 }
   0x3   :  { %s15_s10 = sshll.u32 %s315_s9, 4  ;;  %p244_p0 = scmp.ne.s32.totalorder %s380_s0, %s243_s13  ;;  %s16_s10 = int_to_ptr.vmem [resolvable:$true] %s15_s10 }
   0x4   :  { %p247_p1 = scmp.lt.u32.totalorder %s243_s13, %s380_s0 }
   0x6   :  { %p249_p2 = pnand %p247_p1, %p244_p0 }
   0x8   :  { %252 = shalt.err (!%p249_p2)
}
   0x9   :  { %s253_s18 = scalar_lea.vmem %s16_s10, 256  ;;  %p258_p4 = scmp.lt.s32.totalorder %s16_s10, %s16_s10 }
   0xa   :  { %p254_p3 = scmp.ne.s32.totalorder %s16_s10, %s253_s18  ;;  %p259_p5 = scmp.lt.s32.totalorder %s253_s18, %s253_s18 }
   0xc   :  { %p260_p6 = por %p259_p5, %p258_p4 }
   0xe   :  { %p261_p7 = pnand %p260_p6, %p254_p3 }
  0x10   :  { %264 = shalt.err (!%p261_p7)
}
  0x11   :  { %s316_s19 = smov 128   ;;  %s317_s20 = smov 8  }
  0x12   :  { %21 = dma.hbm_to_vmem [thread:$0]  %s380_s0, 256, %s16_s10, [#allocation3], %s316_s19, %s316_s19, %s317_s20  }
  0x13   :  { %s318_s23 = smov [#allocation5]   ;;  %s265_s27 = scalar_lea.hbm %s381_s1, 2048 }
  0x14   :  { %s27_s24 = sshll.u32 %s318_s23, 4  ;;  %p266_p8 = scmp.ne.s32.totalorder %s381_s1, %s265_s27  ;;  %s28_s24 = int_to_ptr.vmem [resolvable:$true] %s27_s24 }
  0x15   :  { %p269_p9 = scmp.lt.u32.totalorder %s265_s27, %s381_s1 }
  0x17   :  { %p271_p10 = pnand %p269_p9, %p266_p8 }
  0x19   :  { %274 = shalt.err (!%p271_p10)
}
  0x1a   :  { %s275_s4 = scalar_lea.vmem %s28_s24, 2048  ;;  %p280_p12 = scmp.lt.s32.totalorder %s28_s24, %s28_s24 }
  0x1b   :  { %p276_p11 = scmp.ne.s32.totalorder %s28_s24, %s275_s4  ;;  %p281_p13 = scmp.lt.s32.totalorder %s275_s4, %s275_s4 }
  0x1d   :  { %p282_p0 = por %p281_p13, %p280_p12 }
  0x1f   :  { %p283_p1 = pnand %p282_p0, %p276_p11 }
  0x21   :  { %286 = shalt.err (!%p283_p1)
}
  0x22   :  { %33 = dma.hbm_to_vmem [thread:$0]  %s381_s1, 2048, %s28_s24, [#allocation6], %s316_s19, %s316_s19, %s317_s20  }
  0x23   :  { %309 = dma.done.wait [#allocation3], 256  }
  0x24   :  { %310 = vsyncadd [#allocation3], 4294967040 }
  0x25   :  { %311 = dma.done.wait [#allocation6], 2048  }
  0x26   :  { %312 = vsyncadd [#allocation6], 4294965248  ;;  %v42_v0 = vld [vmem:[#allocation5] sm:$0xff]  ;;  %v43_v1 = vld [vmem:[#allocation5 + $0x8] sm:$0xff]  ;;  %s319_s1 = smov [#allocation7]  }
  0x27   :  { %v44_v2 = vld [vmem:[#allocation5 + $0x10] sm:$0xff]  ;;  %v206_v3 = vpack.c.bf16 %v43_v1, %v42_v0  ;;  %v45_v4 = vld [vmem:[#allocation5 + $0x18] sm:$0xff]  ;;  %v46_v6 = vld [vmem:[#allocation5 + $0x20] sm:$0xff]  ;;  %s140_s6 = sshll.u32 %s319_s1, 4  ;;  %s141_s6 = int_to_ptr.vmem [resolvable:$true] %s140_s6 }
  0x28   :  { %v210_v5 = vpack.c.bf16 %v45_v4, %v44_v2  ;;  %v47_v7 = vld [vmem:[#allocation5 + $0x28] sm:$0xff]  ;;  %v40_v9 = vld [vmem:[#allocation2] sm:$0xff]  ;;  %v49_v11 = vld [vmem:[#allocation5 + $0x38] sm:$0xff]  ;;  %s287_s7 = scalar_lea.vmem %s141_s6, 256  ;;  %p292_p3 = scmp.lt.s32.totalorder %s141_s6, %s141_s6 }
  0x29   :  { %207 = vmatprep.subr.bf16.mxu0 %v206_v3  ;;  %v214_v8 = vpack.c.bf16 %v47_v7, %v46_v6  ;;  %v48_v10 = vld [vmem:[#allocation5 + $0x30] sm:$0xff]  ;;  %203 = vmatprep.mubr.f32.mxu0 %v40_v9  ;;  %v50_v13 = vld [vmem:[#allocation5 + $0x40] sm:$0xff]  ;;  %v51_v14 = vld [vmem:[#allocation5 + $0x48] sm:$0xff]  ;;  %p288_p2 = scmp.ne.s32.totalorder %s141_s6, %s287_s7  ;;  %p293_p4 = scmp.lt.s32.totalorder %s287_s7, %s287_s7 }
  0x2a   :  { %209 = vmatpush3.bf16.msra.mxu0 %v206_v3  ;;  %v218_v12 = vpack.c.bf16 %v49_v11, %v48_v10  ;;  %v222_v15 = vpack.c.bf16 %v51_v14, %v50_v13  ;;  %v52_v16 = vld [vmem:[#allocation5 + $0x50] sm:$0xff]  ;;  %v53_v17 = vld [vmem:[#allocation5 + $0x58] sm:$0xff]  ;;  %v54_v19 = vld [vmem:[#allocation5 + $0x60] sm:$0xff] }
  0x2b   :  { %211 = vmatprep.subr.bf16.mxu0 %v210_v5  ;;  %v226_v18 = vpack.c.bf16 %v53_v17, %v52_v16  ;;  %v55_v20 = vld [vmem:[#allocation5 + $0x68] sm:$0xff]  ;;  %v56_v22 = vld [vmem:[#allocation5 + $0x70] sm:$0xff]  ;;  %v57_v23 = vld [vmem:[#allocation5 + $0x78] sm:$0xff]  ;;  %p294_p5 = por %p293_p4, %p292_p3 }
  0x2c   :  { %v230_v21 = vpack.c.bf16 %v55_v20, %v54_v19  ;;  %v234_v24 = vpack.c.bf16 %v57_v23, %v56_v22  ;;  %v41_v25 = vld [vmem:[#allocation2 + $0x8] sm:$0xff] }
  0x2d   :  { %p295_p6 = pnand %p294_p5, %p288_p2 }
  0x2e   :  { %213 = vmatpush3.bf16.msra.mxu0 %v210_v5 }
  0x2f   :  { %215 = vmatprep.subr.bf16.mxu0 %v214_v8 }
  0x32   :  { %217 = vmatpush3.bf16.msra.mxu0 %v214_v8 }
  0x33   :  { %219 = vmatprep.subr.bf16.mxu0 %v218_v12 }
  0x36   :  { %221 = vmatpush3.bf16.msra.mxu0 %v218_v12 }
  0x37   :  { %223 = vmatprep.subr.bf16.mxu0 %v222_v15 }
  0x3a   :  { %225 = vmatpush3.bf16.msra.mxu0 %v222_v15 }
  0x3b   :  { %227 = vmatprep.subr.bf16.mxu0 %v226_v18 }
  0x3e   :  { %229 = vmatpush3.bf16.msra.mxu0 %v226_v18 }
  0x3f   :  { %231 = vmatprep.subr.bf16.mxu0 %v230_v21 }
  0x42   :  { %233 = vmatpush3.bf16.msra.mxu0 %v230_v21 }
  0x43   :  { %235 = vmatprep.subr.bf16.mxu0 %v234_v24 }
  0x46   :  { %237 = vmatpush3.bf16.msra.mxu0 %v234_v24 }
  0x49   :  { %204 = vmatmul.mubr.f32.vlgmr.msra.gmra.mrb[0].mxu0 %v41_v25 }
 0x11c   :  { %v205_v26 = vpop.f32.mrb[0].mxu0 }
 0x11d   :  { %134 = vst [vmem:[#allocation7 + $0x8] sm:$0xff] %v205_v26  ;;  %v124_v27 = vpop.f32.mrb[1].mxu0 }
 0x11e   :  { %133 = vst [vmem:[#allocation7] sm:$0xff] %v124_v27 }
 0x11f   :  { %298 = shalt.err (!%p295_p6)
}
 0x120   :  { %s299_s10 = scalar_lea.hbm %s382_s2, 256 }
 0x121   :  { %p300_p7 = scmp.ne.s32.totalorder %s382_s2, %s299_s10  ;;  %p303_p8 = scmp.lt.u32.totalorder %s299_s10, %s382_s2 }
 0x123   :  { %p305_p9 = pnand %p303_p8, %p300_p7 }
 0x125   :  { %308 = shalt.err (!%p305_p9)
}
 0x126   :  { %146 = dma.vmem_to_hbm [thread:$0]  %s141_s6, 256, %s382_s2, [#allocation4], %s316_s19, %s316_s19, %s317_s20  }
 0x127   :  { %313 = dma.done.wait [#allocation4], 256  }
 0x128   :  { %314 = vsyncadd [#allocation4], 4294967040 }
 0x129   :  { %150 = vsyncpa [#allocation3], 1 }
 0x12a   :  { %151 = vsyncpa [#allocation6], 1 }
 0x12b   :  { %152 = vsyncpa [#allocation4], 1 }

</bundles_post_ra>
